<compile_context>
chip_gen: v7x
topology: tpu7x:2x2x1
jax: 0.10.0
libtpu: 0.0.40
codegen_flags: <defaults>
</compile_context>

<pallas_src>
import functools
import math

import jax
import jax.numpy as jnp
from jax.experimental import pallas as pl
from jax.experimental.pallas import tpu as pltpu


# -----------------------------------------------------------------------------
# Pallas kernels
# -----------------------------------------------------------------------------
def _mm_kernel(a_ref, w_ref, b_ref, *rest, relu, has_res):
    """Tiled matmul, K-accumulated in f32; bias folded into acc init, residual
    add + optional ReLU fused on the last K step."""
    if has_res:
        res_ref, o_ref, acc_ref = rest
    else:
        o_ref, acc_ref = rest

    @pl.when(pl.program_id(2) == 0)
    def _():
        acc_ref[...] = jnp.broadcast_to(b_ref[...], acc_ref.shape)

    acc_ref[...] += jnp.dot(a_ref[...], w_ref[...],
                            preferred_element_type=jnp.float32)

    @pl.when(pl.program_id(2) == pl.num_programs(2) - 1)
    def _():
        r = acc_ref[...]
        if has_res:
            r = r + res_ref[...].astype(jnp.float32)
        if relu:
            r = jnp.maximum(r, 0.0)
        o_ref[...] = r.astype(o_ref.dtype)


def _maxpool_kernel(*refs):
    """Elementwise max over 9 shifted window slices (pure VPU)."""
    o_ref = refs[-1]
    m = refs[0][...]
    for r in refs[1:-1]:
        m = jnp.maximum(m, r[...])
    o_ref[...] = m


def _round_up(x, m):
    return (x + m - 1) // m * m


def pallas_matmul_bias(a, w, b, relu=False, residual=None, out_dtype=jnp.bfloat16):
    """a:(M,K) @ w:(K,N) + b:(N,) [+ residual:(M,N)], bf16 MXU inputs, f32 acc.
    Only K is padded (and only when not already 128-aligned); ragged M/N blocks
    are handled by Pallas masked stores."""
    M, K = a.shape
    K2, N = w.shape
    assert K == K2
    a = a.astype(jnp.bfloat16)
    w = w.astype(jnp.bfloat16)
    b2 = b.astype(jnp.float32).reshape(1, N)

    # Divisor-aware K tiling: tk*nk == round_up(K,128), tk <= 2048.
    Kb = pl.cdiv(K, 128)
    d = max(dd for dd in range(1, min(Kb, 16) + 1) if Kb % dd == 0)
    tk = d * 128
    Kp = Kb * 128
    if Kp != K:
        a = jnp.pad(a, ((0, 0), (0, Kp - K)))
        w = jnp.pad(w, ((0, Kp - K), (0, 0)))

    tm = min(256, _round_up(M, 16))
    tn = N if N <= 128 else 128 * min(4, pl.cdiv(N, 128))

    grid = (pl.cdiv(M, tm), pl.cdiv(N, tn), Kp // tk)

    in_specs = [
        pl.BlockSpec((tm, tk), lambda i, j, k: (i, k)),
        pl.BlockSpec((tk, tn), lambda i, j, k: (k, j)),
        pl.BlockSpec((1, tn), lambda i, j, k: (0, j)),
    ]
    operands = [a, w, b2]
    has_res = residual is not None
    if has_res:
        in_specs.append(pl.BlockSpec((tm, tn), lambda i, j, k: (i, j)))
        operands.append(residual.astype(jnp.bfloat16))

    out = pl.pallas_call(
        functools.partial(_mm_kernel, relu=relu, has_res=has_res),
        out_shape=jax.ShapeDtypeStruct((M, N), out_dtype),
        grid_spec=pltpu.PrefetchScalarGridSpec(
            num_scalar_prefetch=0,
            grid=grid,
            in_specs=in_specs,
            out_specs=pl.BlockSpec((tm, tn), lambda i, j, k: (i, j)),
            scratch_shapes=[pltpu.VMEM((tm, tn), jnp.float32)],
        ),
        compiler_params=pltpu.CompilerParams(
            dimension_semantics=("parallel", "parallel", "arbitrary")),
    )(*operands)
    return out


# -----------------------------------------------------------------------------
# Conv / pool wrappers (im2col glue + Pallas matmul)
# -----------------------------------------------------------------------------
def _extract_patches(x, k, stride, pad):
    """x: (N,H,W,C) -> (N,Ho,Wo,k*k,C) with (di,dj) ordering (bf16-friendly)."""
    N, H, W, C = x.shape
    xp = jnp.pad(x, ((0, 0), (pad, pad), (pad, pad), (0, 0)))
    Ho = (H + 2 * pad - k) // stride + 1
    Wo = (W + 2 * pad - k) // stride + 1
    cols = []
    for di in range(k):
        for dj in range(k):
            cols.append(xp[:, di:di + stride * Ho:stride,
                           dj:dj + stride * Wo:stride, :])
    return jnp.stack(cols, axis=3), Ho, Wo


def conv2d(x, w_mat, bias, k, stride=1, pad=0, relu=False, residual=None,
           out_dtype=jnp.bfloat16):
    """x: (N,H,W,C) NHWC; w_mat: pre-laid (k*k*Cin, Cout) bf16; returns NHWC.
    Optional residual (N,Ho,Wo,Cout) is added (+ReLU) in the matmul epilogue."""
    # TODO(synk): option (a) of fusing the window gather into the matmul via
    # shifted BlockSpec index_maps (implicit GEMM) not implemented; im2col glue.
    N = x.shape[0]
    Cin = x.shape[-1]
    Cout = w_mat.shape[1]
    patches, Ho, Wo = _extract_patches(x, k, stride, pad)
    a = patches.reshape(N * Ho * Wo, k * k * Cin)
    res = residual.reshape(N * Ho * Wo, Cout) if residual is not None else None
    out = pallas_matmul_bias(a, w_mat, bias, relu=relu, residual=res,
                             out_dtype=out_dtype)
    return out.reshape(N, Ho, Wo, Cout)


def maxpool_3x3_s2(x):
    """3x3 stride-2 pad-1 maxpool, tiled over rows.  Inputs are post-ReLU (>=0)
    so zero padding is equivalent to -inf padding."""
    N, H, W, C = x.shape
    xp = jnp.pad(x, ((0, 0), (1, 1), (1, 1), (0, 0)))
    Ho = (H + 2 - 3) // 2 + 1
    Wo = (W + 2 - 3) // 2 + 1
    M = N * Ho * Wo
    slices = []
    for di in range(3):
        for dj in range(3):
            s = xp[:, di:di + 2 * Ho:2, dj:dj + 2 * Wo:2, :]
            slices.append(s.reshape(M, C))
    tmb = min(1024, _round_up(M, 16))
    out = pl.pallas_call(
        _maxpool_kernel,
        out_shape=jax.ShapeDtypeStruct((M, C), x.dtype),
        grid_spec=pltpu.PrefetchScalarGridSpec(
            num_scalar_prefetch=0,
            grid=(pl.cdiv(M, tmb),),
            in_specs=[pl.BlockSpec((tmb, C), lambda i: (i, 0)) for _ in range(9)],
            out_specs=pl.BlockSpec((tmb, C), lambda i: (i, 0)),
        ),
        compiler_params=pltpu.CompilerParams(dimension_semantics=("parallel",)),
    )(*slices)
    return out.reshape(N, Ho, Wo, C)


# -----------------------------------------------------------------------------
# Parameter construction (deterministic synthetic weights, eval-mode BN folded,
# weights pre-transposed to (K, N) and pre-cast to bf16 once at init)
# -----------------------------------------------------------------------------
def _fold_bn(w_oihw, gamma, beta, mean, var, eps=1e-5):
    scale = gamma / jnp.sqrt(var + eps)
    return w_oihw * scale[:, None, None, None], beta - mean * scale


def _to_mat(w_oihw):
    cout, cin, kh, kw = w_oihw.shape
    return jnp.transpose(w_oihw, (2, 3, 1, 0)).reshape(kh * kw * cin, cout).astype(jnp.bfloat16)


def make_conv_bn(key, cout, cin, k):
    k1, k2, k3, k4, k5 = jax.random.split(key, 5)
    w = jax.random.normal(k1, (cout, cin, k, k), jnp.float32) / math.sqrt(cin * k * k)
    gamma = 1.0 + 0.1 * jax.random.normal(k2, (cout,), jnp.float32)
    beta = 0.1 * jax.random.normal(k3, (cout,), jnp.float32)
    mean = 0.1 * jax.random.normal(k4, (cout,), jnp.float32)
    var = 1.0 + 0.1 * jax.random.uniform(k5, (cout,), jnp.float32)
    wf, bf = _fold_bn(w, gamma, beta, mean, var)
    return _to_mat(wf), bf.astype(jnp.float32)


def make_conv_bias(key, cout, cin, k):
    k1, k2 = jax.random.split(key)
    w = jax.random.normal(k1, (cout, cin, k, k), jnp.float32) / math.sqrt(cin * k * k)
    b = 0.01 * jax.random.normal(k2, (cout,), jnp.float32)
    return _to_mat(w), b


def make_linear(key, fin, fout):
    k1, k2 = jax.random.split(key)
    w = jax.random.normal(k1, (fin, fout), jnp.float32) / math.sqrt(fin)
    b = 0.01 * jax.random.normal(k2, (fout,), jnp.float32)
    return w.astype(jnp.bfloat16), b


def init_params(key, num_classes):
    keys = iter(jax.random.split(key, 64))
    p = {}
    # resnet18 backbone (children()[:-2]): conv1+bn+relu, maxpool, layer1..layer4
    p["conv1"] = make_conv_bn(next(keys), 64, 3, 7)
    cfg = [(64, 64, 1), (64, 64, 1),      # layer1
           (64, 128, 2), (128, 128, 1),   # layer2
           (128, 256, 2), (256, 256, 1),  # layer3
           (256, 512, 2), (512, 512, 1)]  # layer4
    blocks = []
    for cin, cout, stride in cfg:
        blk = {"conv1": make_conv_bn(next(keys), cout, cin, 3),
               "conv2": make_conv_bn(next(keys), cout, cout, 3),
               "stride": stride}
        if stride != 1 or cin != cout:
            blk["down"] = make_conv_bn(next(keys), cout, cin, 1)
        blocks.append(blk)
    p["blocks"] = blocks
    # RPN head: 5 sizes x 3 aspect ratios = 15 anchors / location
    num_anchors = 15
    p["num_anchors"] = num_anchors
    p["rpn_conv"] = make_conv_bias(next(keys), 512, 512, 3)
    wc, bc = make_conv_bias(next(keys), num_anchors, 512, 1)
    wb, bb = make_conv_bias(next(keys), num_anchors * 4, 512, 1)
    p["rpn_head"] = (jnp.concatenate([wc, wb], axis=1),
                     jnp.concatenate([bc, bb], axis=0))          # fused cls+bbox
    # Box head: TwoMLPHead(512*7*7 -> 1024 -> 1024) + FastRCNNPredictor (fused)
    p["fc6"] = make_linear(next(keys), 512 * 7 * 7, 1024)
    p["fc7"] = make_linear(next(keys), 1024, 1024)
    wcs, bcs = make_linear(next(keys), 1024, num_classes)
    wbp, bbp = make_linear(next(keys), 1024, num_classes * 4)
    p["box_head"] = (jnp.concatenate([wcs, wbp], axis=1),
                     jnp.concatenate([bcs, bbp], axis=0))
    return p


# -----------------------------------------------------------------------------
# Model forward pieces
# -----------------------------------------------------------------------------
def basic_block(x, blk):
    w1, b1 = blk["conv1"]
    w2, b2 = blk["conv2"]
    out = conv2d(x, w1, b1, 3, stride=blk["stride"], pad=1, relu=True)
    if "down" in blk:
        wd, bd = blk["down"]
        identity = conv2d(x, wd, bd, 1, stride=blk["stride"], pad=0, relu=False)
    else:
        identity = x
    # residual add + ReLU fused into the second conv's matmul epilogue
    return conv2d(out, w2, b2, 3, stride=1, pad=1, relu=True, residual=identity)


def backbone_forward(params, x):
    w, b = params["conv1"]
    x = conv2d(x, w, b, 7, stride=2, pad=3, relu=True)
    x = maxpool_3x3_s2(x)
    for blk in params["blocks"]:
        x = basic_block(x, blk)
    return x  # (N, H/32, W/32, 512)


def rpn_forward(params, feat):
    t = conv2d(feat, *params["rpn_conv"], 3, stride=1, pad=1, relu=True)
    N, Hf, Wf, C = t.shape
    A = params["num_anchors"]
    # fused 1x1 heads: objectness (A) + box deltas (4A) in a single matmul
    w, b = params["rpn_head"]
    out = pallas_matmul_bias(t.reshape(N * Hf * Wf, C), w, b, out_dtype=jnp.float32)
    obj = out[:, :A].reshape(N, Hf * Wf * A)
    deltas = out[:, A:].reshape(N, Hf * Wf * A, 4)
    return obj, deltas


def generate_anchors(Hf, Wf, stride,
                     sizes=(32, 64, 128, 256, 512), ratios=(0.5, 1.0, 2.0)):
    scales = jnp.array(sizes, jnp.float32)
    ars = jnp.array(ratios, jnp.float32)
    h_r = jnp.sqrt(ars)
    w_r = 1.0 / h_r
    ws = (w_r[:, None] * scales[None, :]).reshape(-1)
    hs = (h_r[:, None] * scales[None, :]).reshape(-1)
    base = jnp.round(jnp.stack([-ws, -hs, ws, hs], axis=1) / 2.0)  # (15,4)
    sx = (jnp.arange(Wf) * stride).astype(jnp.float32)
    sy = (jnp.arange(Hf) * stride).astype(jnp.float32)
    gy, gx = jnp.meshgrid(sy, sx, indexing="ij")
    shifts = jnp.stack([gx.ravel(), gy.ravel(), gx.ravel(), gy.ravel()], axis=1)
    return (shifts[:, None, :] + base[None, :, :]).reshape(-1, 4)  # (Hf*Wf*15,4)


def decode_boxes(deltas, ref, weights=(1.0, 1.0, 1.0, 1.0)):
    wx, wy, ww, wh = weights
    widths = ref[..., 2] - ref[..., 0]
    heights = ref[..., 3] - ref[..., 1]
    ctr_x = ref[..., 0] + 0.5 * widths
    ctr_y = ref[..., 1] + 0.5 * heights
    clip = math.log(1000.0 / 16)
    dx, dy = deltas[..., 0] / wx, deltas[..., 1] / wy
    dw = jnp.minimum(deltas[..., 2] / ww, clip)
    dh = jnp.minimum(deltas[..., 3] / wh, clip)
    pcx = dx * widths + ctr_x
    pcy = dy * heights + ctr_y
    pw = jnp.exp(dw) * widths
    ph = jnp.exp(dh) * heights
    return jnp.stack([pcx - 0.5 * pw, pcy - 0.5 * ph,
                      pcx + 0.5 * pw, pcy + 0.5 * ph], axis=-1)


def roi_align_single(feat, boxes, out_size=7, sampling=2, spatial_scale=1.0 / 32.0):
    """Simplified MultiScaleRoIAlign (aligned=False) on one feature map; plain-JAX
    gather glue (data-dependent bilinear sampling)."""
    feat = feat.astype(jnp.float32)
    Hf, Wf, C = feat.shape
    b = boxes * spatial_scale
    x1, y1, x2, y2 = b[:, 0], b[:, 1], b[:, 2], b[:, 3]
    roi_w = jnp.maximum(x2 - x1, 1.0)
    roi_h = jnp.maximum(y2 - y1, 1.0)
    bin_w = roi_w / out_size
    bin_h = roi_h / out_size
    grid = jnp.arange(out_size, dtype=jnp.float32)
    samp = (jnp.arange(sampling, dtype=jnp.float32) + 0.5) / sampling
    ys = y1[:, None, None] + (grid[None, :, None] + samp[None, None, :]) * bin_h[:, None, None]
    xs = x1[:, None, None] + (grid[None, :, None] + samp[None, None, :]) * bin_w[:, None, None]
    R = boxes.shape[0]
    Y = jnp.broadcast_to(ys[:, :, None, :, None], (R, out_size, out_size, sampling, sampling))
    X = jnp.broadcast_to(xs[:, None, :, None, :], (R, out_size, out_size, sampling, sampling))

    y0 = jnp.floor(Y); x0 = jnp.floor(X)
    wy1 = Y - y0; wx1 = X - x0
    wy0 = 1.0 - wy1; wx0 = 1.0 - wx1
    y0c = jnp.clip(y0, 0, Hf - 1).astype(jnp.int32)
    y1c = jnp.clip(y0 + 1, 0, Hf - 1).astype(jnp.int32)
    x0c = jnp.clip(x0, 0, Wf - 1).astype(jnp.int32)
    x1c = jnp.clip(x0 + 1, 0, Wf - 1).astype(jnp.int32)
    v = (feat[y0c, x0c] * (wy0 * wx0)[..., None] + feat[y0c, x1c] * (wy0 * wx1)[..., None]
         + feat[y1c, x0c] * (wy1 * wx0)[..., None] + feat[y1c, x1c] * (wy1 * wx1)[..., None])
    return v.mean(axis=(3, 4))  # (R, 7, 7, C)


def detector_forward(params, images_nchw, num_classes, topk=16):
    """Inference path of AerialDetector.forward(images) (targets=None).
    TODO(synk): training-mode loss computation (targets) not implemented."""
    # layout: convert PyTorch NCHW -> NHWC; activations carried in bf16.
    x = jnp.transpose(images_nchw, (0, 2, 3, 1)).astype(jnp.float32)
    mean = jnp.array([0.485, 0.456, 0.406], jnp.float32)
    std = jnp.array([0.229, 0.224, 0.225], jnp.float32)
    x = ((x - mean) / std).astype(jnp.bfloat16)
    # TODO(synk): GeneralizedRCNNTransform image resizing (min_size=800) omitted.

    feat = backbone_forward(params, x)                # (N, Hf, Wf, 512) bf16
    N, Hf, Wf, C = feat.shape
    img_size = images_nchw.shape[2]
    stride = img_size // Hf

    obj, deltas = rpn_forward(params, feat)
    anchors = generate_anchors(Hf, Wf, stride)
    prop_boxes = decode_boxes(deltas, anchors)        # (N, A, 4)
    prop_boxes = jnp.clip(prop_boxes, 0.0, float(img_size))
    k = min(topk, prop_boxes.shape[1])
    top_scores, idx = jax.lax.top_k(obj, k)
    props = jnp.take_along_axis(prop_boxes, idx[..., None], axis=1)  # (N, k, 4)
    # TODO(synk): RPN NMS / post_nms_top_n filtering omitted (data-dependent, sequential).

    pooled = jnp.concatenate([roi_align_single(feat[i], props[i]) for i in range(N)], axis=0)
    flat = jnp.transpose(pooled, (0, 3, 1, 2)).reshape(pooled.shape[0], -1)  # (N*k, C*7*7)

    h = pallas_matmul_bias(flat, *params["fc6"], relu=True)
    h = pallas_matmul_bias(h, *params["fc7"], relu=True)
    # fused cls_score + bbox_pred matmul
    head = pallas_matmul_bias(h, *params["box_head"], out_dtype=jnp.float32)
    logits = head[:, :num_classes]
    box_reg = head[:, num_classes:]

    scores = jax.nn.softmax(logits, axis=-1).reshape(N, k, num_classes)
    box_reg = box_reg.reshape(N, k, num_classes, 4)
    det_boxes = decode_boxes(box_reg, props[:, :, None, :], weights=(10.0, 10.0, 5.0, 5.0))
    det_boxes = jnp.clip(det_boxes, 0.0, float(img_size))
    # TODO(synk): per-class score thresholding + batched NMS postprocessing omitted.

    return [{"boxes": det_boxes[i], "scores": scores[i],
             "proposals": props[i], "proposal_scores": jax.nn.sigmoid(top_scores[i])}
            for i in range(N)]


# -----------------------------------------------------------------------------
if __name__ == "__main__":
    num_classes = 5
    key = jax.random.PRNGKey(0)
    pkey, xkey = jax.random.split(key)
    params = init_params(pkey, num_classes)
    images = jax.random.uniform(xkey, (2, 3, 64, 64), jnp.float32)  # NCHW like PyTorch

    out = detector_forward(params, images, num_classes)
    jax.block_until_ready(out)
    print("KERNEL_OK")
</pallas_src>

<mosaic_0001>
module attributes {stable_mosaic.version = 11 : i64} {
  func.func @_mm_kernel(%arg0: i32, %arg1: i32, %arg2: i32, %arg3: memref<256x256xbf16, #tpu.memory_space<vmem>>, %arg4: memref<256x64xbf16, #tpu.memory_space<vmem>>, %arg5: memref<1x64xf32, #tpu.memory_space<vmem>>, %arg6: memref<256x64xbf16, #tpu.memory_space<vmem>>, %arg7: memref<256x64xf32, #tpu.memory_space<vmem>>) attributes {dimension_semantics = [#tpu.dimension_semantics<parallel>, #tpu.dimension_semantics<parallel>, #tpu.dimension_semantics<arbitrary>], iteration_bounds = array<i64: 8, 1, 1>, scalar_prefetch = 0 : i64, scratch_operands = 1 : i64, tpu.core_type = #tpu.core_type<tc>, window_params = [{transform_indices = @transform_0, window_bounds = array<i64: 256, 256>}, {transform_indices = @transform_1, window_bounds = array<i64: 256, 64>}, {transform_indices = @transform_2, window_bounds = array<i64: 1, 64>}, {transform_indices = @transform_3, window_bounds = array<i64: 256, 64>}]} {
    %c0_i32 = arith.constant 0 : i32
    %0 = arith.cmpi eq, %arg2, %c0_i32 : i32
    %1 = arith.extui %0 : i1 to i32
    %c0_i32_0 = arith.constant 0 : i32
    %2 = arith.cmpi ne, %1, %c0_i32_0 : i32
    scf.if %2 {
      %c0_10 = arith.constant 0 : index
      %c0_11 = arith.constant 0 : index
      %12 = vector.load %arg5[%c0_10, %c0_11] : memref<1x64xf32, #tpu.memory_space<vmem>>, vector<1x64xf32>
      %13 = vector.shape_cast %12 : vector<1x64xf32> to vector<1x64xf32>
      %14 = vector.broadcast %13 : vector<1x64xf32> to vector<256x64xf32>
      %c0_12 = arith.constant 0 : index
      %c0_13 = arith.constant 0 : index
      %15 = vector.load %arg7[%c0_12, %c0_13] : memref<256x64xf32, #tpu.memory_space<vmem>>, vector<256x64xf32>
      tpu.vector_store %arg7[%c0_12, %c0_13], %14 {strides = array<i32>} : memref<256x64xf32, #tpu.memory_space<vmem>>, vector<256x64xf32>,
    } else {
    }
    %c0 = arith.constant 0 : index
    %c0_1 = arith.constant 0 : index
    %3 = vector.load %arg7[%c0, %c0_1] : memref<256x64xf32, #tpu.memory_space<vmem>>, vector<256x64xf32>
    %c0_2 = arith.constant 0 : index
    %c0_3 = arith.constant 0 : index
    %4 = vector.load %arg3[%c0_2, %c0_3] : memref<256x256xbf16, #tpu.memory_space<vmem>>, vector<256x256xbf16>
    %c0_4 = arith.constant 0 : index
    %c0_5 = arith.constant 0 : index
    %5 = vector.load %arg4[%c0_4, %c0_5] : memref<256x64xbf16, #tpu.memory_space<vmem>>, vector<256x64xbf16>
    %cst = arith.constant dense<0.000000e+00> : vector<256x64xf32>
    %6 = tpu.matmul %4, %5, %cst {dimension_numbers = #tpu.dot_dimension_numbers<[1], [0], [0], [1], [0, 0, 1, 1], [], []>} : vector<256x256xbf16>, vector<256x64xbf16>, vector<256x64xf32> -> vector<256x64xf32>
    %7 = arith.addf %3, %6 : vector<256x64xf32>
    %c0_6 = arith.constant 0 : index
    %c0_7 = arith.constant 0 : index
    %8 = vector.load %arg7[%c0_6, %c0_7] : memref<256x64xf32, #tpu.memory_space<vmem>>, vector<256x64xf32>
    tpu.vector_store %arg7[%c0_6, %c0_7], %7 {strides = array<i32>} : memref<256x64xf32, #tpu.memory_space<vmem>>, vector<256x64xf32>,
    %c0_i32_8 = arith.constant 0 : i32
    %9 = arith.cmpi eq, %arg2, %c0_i32_8 : i32
    %10 = arith.extui %9 : i1 to i32
    %c0_i32_9 = arith.constant 0 : i32
    %11 = arith.cmpi ne, %10, %c0_i32_9 : i32
    scf.if %11 {
      %c0_10 = arith.constant 0 : index
      %c0_11 = arith.constant 0 : index
      %12 = vector.load %arg7[%c0_10, %c0_11] : memref<256x64xf32, #tpu.memory_space<vmem>>, vector<256x64xf32>
      %cst_12 = arith.constant 0.000000e+00 : f32
      %13 = vector.broadcast %cst_12 : f32 to vector<256x64xf32>
      %14 = arith.maximumf %12, %13 : vector<256x64xf32>
      %15 = arith.truncf %14 : vector<256x64xf32> to vector<256x64xbf16>
      %c0_13 = arith.constant 0 : index
      %c0_14 = arith.constant 0 : index
      %16 = vector.load %arg6[%c0_13, %c0_14] : memref<256x64xbf16, #tpu.memory_space<vmem>>, vector<256x64xbf16>
      tpu.vector_store %arg6[%c0_13, %c0_14], %15 {strides = array<i32>} : memref<256x64xbf16, #tpu.memory_space<vmem>>, vector<256x64xbf16>,
    } else {
    }
    return
  }
  func.func @transform_0(%arg0: i32, %arg1: i32, %arg2: i32) -> (i32, i32) {
    %c0_i32 = arith.constant 0 : i32
    return %arg0, %arg2 : i32, i32
  }
  func.func @transform_1(%arg0: i32, %arg1: i32, %arg2: i32) -> (i32, i32) {
    %c0_i32 = arith.constant 0 : i32
    return %arg2, %arg1 : i32, i32
  }
  func.func @transform_2(%arg0: i32, %arg1: i32, %arg2: i32) -> (i32, i32) {
    %c0_i32 = arith.constant 0 : i32
    %c0_i32_0 = arith.constant 0 : i32
    return %c0_i32, %arg1 : i32, i32
  }
  func.func @transform_3(%arg0: i32, %arg1: i32, %arg2: i32) -> (i32, i32) {
    %c0_i32 = arith.constant 0 : i32
    return %arg0, %arg1 : i32, i32
  }
}

</mosaic_0001>

<bundles_post_ra>
// kernel: tpu_custom_call.1
= control target key start
LH: loop header
LB: loop body
LE: loop exit
PB: predicated region body
PF: predicated region fallthrough
CT: control target
= control target key end

     0   :  { %8 = vsyncpa [#allocation4], 0  ;;  %s2072_s0 = inlined_call_operand.hbm [shape: bf16[2048,256], index: 0, kind: input, shape index: {}]   ;;  %s2073_s1 = inlined_call_operand.vmem [shape: bf16[256,64], index: 1, kind: input, shape index: {}]   ;;  %s2074_s2 = inlined_call_operand.vmem [shape: f32[1,64], index: 2, kind: input, shape index: {}]   ;;  %s2075_s3 = inlined_call_operand.vmem [shape: bf16[2048,64], index: 3, kind: output, shape index: {}]  }
   0x1   :  { %10 = vsyncpa [#allocation4 + $0x1], 0  ;;  %s1731_s12 = smov 0   ;;  %s1733_s13 = smov 0  }
   0x2   :  { %s1735_s14 = smov 0   ;;  %s1737_s15 = smov 0  }
   0x3   :  { %s1739_s16 = smov 0   ;;  %s1741_s17 = smov 0  }
   0x4 LB: > { %s1246_s18 = sadd.s32 4294967295, %s1706_s17   ;;  %s35_s19 = sadd.s32 1, %s1702_s16  ;;  %s1706_s17 = sphi %s1741_s17, %s16_s17   ;;  %s1702_s16 = sphi %s1739_s16, %s2083_s16   ;;  %s1698_s15 = sphi %s1737_s15, %s2082_s15   ;;  %s1694_s14 = sphi %s1735_s14, %s2081_s14   ;;  %s1690_s13 = sphi %s1733_s13, %s2080_s13   ;;  %s1686_s12 = sphi %s1731_s12, %s2079_s12  }
   0x5   : > { %p37_p0 = scmp.ge.s32.totalorder %s35_s19, 8  ;;  %s44_s20 = sadd.s32 1, %s1694_s14 }
   0x6   : > { %p51_p1 = scmp.ne.s32.totalorder %s1694_s14, %s1690_s13  ;;  %p52_p2 = scmp.eq.s32.totalorder %s1706_s17, 0 }
   0x7   : > { %s2085_s19 = smov (%p37_p0, %s35_s19), 0  ;;  %p57_p4 = scmp.ne.s32.totalorder %s1690_s13, %s1686_s12 }
   0x8   : > { %p1767_p3 = por %p52_p2, %p51_p1  ;;  %s39_s22 = ssub.s32 %s1702_s16, %s2085_s19 }
   0x9   : > { %p58_p5 = scmp.eq.s32.totalorder %s1246_s18, 0  ;;  %p42_p6 = scmp.eq.s32.totalorder %s39_s22, 0 }
   0xa   : > { %p1511_p8 = scmp.lt.s32.totalorder %s1706_s17, 8  ;;  %s181_s25 = sand.u32 1, %s1694_s14  }
   0xb   : > { %p1774_p7 = por %p58_p5, %p57_p4  ;;  %s1344_s26 = sshll.u32 %s1702_s16, 12 }
   0xc   : > { %s1780_s24 = scalar_select %p42_p6, %s1694_s14, %s44_s20  }
   0xd   : > { %s1252_s27 = sshll.u32 %s181_s25, 8  ;;  %s1787_s30 = scalar_lea.hbm %s2072_s0, %s1344_s26 }
   0xe   : > { %s185_s4 = scalar_lea.vmem [#allocation3], %s1252_s27  ;;  %p1791_p9 = pnand %p1511_p8, %p1767_p3 }
   0xf   : > { %s195_s5 = sshll.u32 %s185_s4, 4  ;;  %s1797_s7 = scalar_lea.sflag [#allocation4], %s181_s25  ;;  %s1795_s5 = int_to_ptr.vmem [resolvable:$true] %s195_s5 }
  0x10   : > { %s1626_s8 = scalar_lea.hbm %s1787_s30, 4096  ;;  %p1628_p11 = pneg %p1791_p9 }
  0x11   : > { %p1627_p10 = scmp.ne.s32.totalorder %s1787_s30, %s1626_s8  ;;  %s1631_s11 = scalar_lea.hbm %s2072_s0, 32768 }
  0x12   : > { %p1632_p0 = scmp.lt.u32.totalorder %s1787_s30, %s2072_s0  ;;  %p1633_p1 = scmp.lt.u32.totalorder %s1631_s11, %s1626_s8 }
  0x13   : > { %p1629_p12 = pnand %p1628_p11, %p1627_p10  ;;  %p1635_p3 = scmp.lt.u32.totalorder %s1626_s8, %s1787_s30 }
  0x14   : > { %p1634_p2 = por %p1633_p1, %p1632_p0 }
  0x15   : > { %p1630_p13 = pneg %p1629_p12 }
  0x16   : > { %p1636_p4 = por %p1635_p3, %p1634_p2 }
  0x18   : > { %p1637_p5 = pnand %p1636_p4, %p1630_p13 }
  0x1a   : > { %1640 = shalt.err (!%p1637_p5)
}
  0x1b   : > { %s1641_s20 = scalar_lea.vmem %s1795_s5, 4096  ;;  %s1708_s21 = smov [#allocation3]  }
  0x1c   : > { %p1642_p6 = scmp.ne.s32.totalorder %s1795_s5, %s1641_s20  ;;  %s1646_s22 = sshll.u32 %s1708_s21, 4  ;;  %s1647_s22 = int_to_ptr.vmem [resolvable:$false] %s1646_s22 }
  0x1d   : > { %s1648_s25 = scalar_lea.vmem %s1647_s22, 8192  ;;  %p1649_p12 = scmp.lt.s32.totalorder %s1795_s5, %s1647_s22 }
  0x1e   : > { %p1644_p8 = pnand %p1642_p6, %p1628_p11  ;;  %p1650_p0 = scmp.lt.s32.totalorder %s1648_s25, %s1641_s20 }
  0x20   : > { %p1645_p10 = pneg %p1644_p8  ;;  %p1651_p1 = por %p1650_p0, %p1649_p12 }
  0x22   : > { %p1652_p2 = pnand %p1651_p1, %p1645_p10 }
  0x24   : > { %1655 = shalt.err (!%p1652_p2)
}
  0x25   : > { %s1709_s26 = smov 128   ;;  %s1710_s27 = smov 8  }
  0x26   : > { %1510 = dma.hbm_to_vmem [thread:$0]  (!%p1791_p9), %s1787_s30, 4096, %s1795_s5, %s1797_s7, %s1709_s26, %s1709_s26, %s1710_s27  }
  0x27   : > { %p1256_p11 = scmp.ge.s32.totalorder %s1706_s17, 1  ;;  %p203_p13 = scmp.lt.s32.totalorder %s1706_s17, 9 }
  0x29   : > { %p204_p3 = pnand %p1256_p11, %p203_p13 }
  0x2a   : > { %s209_s28 = sand.u32 (!%p204_p3), 1, %s1690_s13  }
  0x2b   : > { %207 = sbr.rel (%p204_p3) target bundleno = 373 (0x175), region = 32  ;;  %s1257_s29 = sshll.u32 (!%p204_p3), %s209_s28, 8 }
  0x2c   : > { %s210_s4 = scalar_lea.sflag (!%p204_p3), [#allocation4], %s209_s28  ;;  %s1828_s8 = scalar_lea.vmem (!%p204_p3), [#allocation3], %s1257_s29 }
  0x32   : > { %1681 = dma.done.wait (%p1774_p7), %s210_s4, 4096  }
  0x33   : > { %1683 = vsyncadd (%p1774_p7), %s210_s4, 4294963200  ;;  %v1562_v0 = vld [vmem:[%s2073_s1 + $0x40] sm:$0xff]   ;;  %v1564_v2 = vld [vmem:[%s2073_s1 + $0x48] sm:$0xff]   ;;  %vm285_vm0 = vcmask 523264   ;;  %vm1091_vm1 = vcmask 519168  }
  0x34   : > { %v1563_v1 = vld [vmem:[%s2073_s1] sm:$0xff]   ;;  %1377 = vmatprep.subr.bf16.mxu0 %v1562_v0  ;;  %1489 = vmatprep.subr.bf16.mxu1 %v1562_v0  ;;  %v1565_v3 = vld [vmem:[%s2073_s1 + $0x8] sm:$0xff]   ;;  %v1566_v4 = vld [vmem:[%s2073_s1 + $0x50] sm:$0xff]  }
  0x35   : > { %1378 = vmatpush3.bf16.msra.mxu0 %v1563_v1  ;;  %1497 = vmatpush3.bf16.msra.mxu1 %v1563_v1  ;;  %v1567_v5 = vld [vmem:[%s2073_s1 + $0x10] sm:$0xff]   ;;  %v1568_v6 = vld [vmem:[%s2073_s1 + $0x58] sm:$0xff]   ;;  %v1570_v8 = vld [vmem:[%s2073_s1 + $0x60] sm:$0xff]  }
  0x36   : > { %1379 = vmatprep.subr.bf16.mxu0 %v1564_v2  ;;  %1490 = vmatprep.subr.bf16.mxu1 %v1564_v2  ;;  %v1569_v7 = vld [vmem:[%s2073_s1 + $0x18] sm:$0xff]   ;;  %v1571_v9 = vld [vmem:[%s2073_s1 + $0x20] sm:$0xff]   ;;  %v1572_v10 = vld [vmem:[%s2073_s1 + $0x68] sm:$0xff]  }
  0x37   : > { %v1580_v11 = vld [vmem:[%s1828_s8 + $0x4] ss:$8 sps:$4 sm:$0xff]   ;;  %v1574_v14 = vld [vmem:[%s2073_s1 + $0x70] sm:$0xff]   ;;  %v1576_v16 = vld [vmem:[%s2073_s1 + $0x78] sm:$0xff]  }
  0x38   : > { %v1583_v12 = vld [vmem:[%s1828_s8 + $0x84] ss:$8 sps:$4 sm:$0xff]   ;;  %702 = vmatprep.mubr.bf16.mxu0 %v1580_v11  ;;  %v1575_v15 = vld [vmem:[%s2073_s1 + $0x30] sm:$0xff]   ;;  %v1577_v17 = vld [vmem:[%s2073_s1 + $0x38] sm:$0xff]  }
  0x39   : > { %1380 = vmatpush3.bf16.msra.mxu0 %v1565_v3  ;;  %1498 = vmatpush3.bf16.msra.mxu1 %v1565_v3  ;;  %v1573_v13 = vld [vmem:[%s2073_s1 + $0x28] sm:$0xff]   ;;  %v1584_v20 = vld [vmem:[%s1828_s8 + $0x14] ss:$8 sps:$4 sm:$0xff]   ;;  %v1588_v22 = vld [vmem:[%s1828_s8 + $0x10] ss:$8 sps:$4 sm:$0xff]  }
  0x3a   : > { %1381 = vmatprep.subr.bf16.mxu0 %v1566_v4  ;;  %1491 = vmatprep.subr.bf16.mxu1 %v1566_v4  ;;  %v1578_v18 = vld [vmem:[%s1828_s8] ss:$8 sps:$4 sm:$0xff]   ;;  %v1586_v21 = vld [vmem:[%s1828_s8 + $0x94] ss:$8 sps:$4 sm:$0xff]   ;;  %v1589_v23 = vld [vmem:[%s1828_s8 + $0x90] ss:$8 sps:$4 sm:$0xff]  }
  0x3b   : > { %766 = vmatprep.mubr.bf16.mxu1 %v1583_v12  ;;  %v1581_v19 = vld [vmem:[%s1828_s8 + $0x80] ss:$8 sps:$4 sm:$0xff]   ;;  %v1590_v24 = vld [vmem:[%s1828_s8 + $0x24] ss:$8 sps:$4 sm:$0xff]   ;;  %v1596_v28 = vld [vmem:[%s1828_s8 + $0x34] ss:$8 sps:$4 sm:$0xff]  }
  0x3c   : > { %v1592_v25 = vld [vmem:[%s1828_s8 + $0xa4] ss:$8 sps:$4 sm:$0xff]   ;;  %v1594_v26 = vld [vmem:[%s1828_s8 + $0x20] ss:$8 sps:$4 sm:$0xff]   ;;  %v1598_v29 = vld [vmem:[%s1828_s8 + $0xb4] ss:$8 sps:$4 sm:$0xff]  }
  0x3d   : > { %1382 = vmatpush3.bf16.msra.mxu0 %v1567_v5  ;;  %1499 = vmatpush3.bf16.msra.mxu1 %v1567_v5  ;;  %v1595_v27 = vld [vmem:[%s1828_s8 + $0xa0] ss:$8 sps:$4 sm:$0xff]   ;;  %v1600_v30 = vld [vmem:[%s1828_s8 + $0x30] ss:$8 sps:$4 sm:$0xff]   ;;  %v1602_v32 = vld [vmem:[%s1828_s8 + $0x44] ss:$8 sps:$4 sm:$0xff]  }
  0x3e   : > { %1383 = vmatprep.subr.bf16.mxu0 %v1568_v6  ;;  %1492 = vmatprep.subr.bf16.mxu1 %v1568_v6  ;;  %v1601_v31 = vld [vmem:[%s1828_s8 + $0xb0] ss:$8 sps:$4 sm:$0xff]   ;;  %v1604_v33 = vld [vmem:[%s1828_s8 + $0xc4] ss:$8 sps:$4 sm:$0xff]   ;;  %v1606_v34 = vld [vmem:[%s1828_s8 + $0x40] ss:$8 sps:$4 sm:$0xff]  }
  0x3f   : > { %v1607_v35 = vld [vmem:[%s1828_s8 + $0xc0] ss:$8 sps:$4 sm:$0xff]   ;;  %v1608_v36 = vld [vmem:[%s1828_s8 + $0x54] ss:$8 sps:$4 sm:$0xff]   ;;  %v1612_v38 = vld [vmem:[%s1828_s8 + $0x50] ss:$8 sps:$4 sm:$0xff]  }
  0x40   : > { %v1610_v37 = vld [vmem:[%s1828_s8 + $0xd4] ss:$8 sps:$4 sm:$0xff]   ;;  %v1613_v39 = vld [vmem:[%s1828_s8 + $0xd0] ss:$8 sps:$4 sm:$0xff]   ;;  %v1614_v40 = vld [vmem:[%s1828_s8 + $0x64] ss:$8 sps:$4 sm:$0xff]  }
  0x41   : > { %1384 = vmatpush3.bf16.msra.mxu0 %v1569_v7  ;;  %1500 = vmatpush3.bf16.msra.mxu1 %v1569_v7  ;;  %v1616_v41 = vld [vmem:[%s1828_s8 + $0xe4] ss:$8 sps:$4 sm:$0xff]   ;;  %v1618_v42 = vld [vmem:[%s1828_s8 + $0x60] ss:$8 sps:$4 sm:$0xff]   ;;  %v1620_v44 = vld [vmem:[%s1828_s8 + $0x74] ss:$8 sps:$4 sm:$0xff]  }
  0x42   : > { %1385 = vmatprep.subr.bf16.mxu0 %v1570_v8  ;;  %1493 = vmatprep.subr.bf16.mxu1 %v1570_v8  ;;  %v1619_v43 = vld [vmem:[%s1828_s8 + $0xe0] ss:$8 sps:$4 sm:$0xff]   ;;  %v1622_v45 = vld [vmem:[%s1828_s8 + $0xf4] ss:$8 sps:$4 sm:$0xff]   ;;  %v1624_v46 = vld [vmem:[%s1828_s8 + $0x70] ss:$8 sps:$4 sm:$0xff]  }
  0x43   : > { %v1625_v47 = vld [vmem:[%s1828_s8 + $0xf0] ss:$8 sps:$4 sm:$0xff]   ;;  %v1260_v48 = vld [vmem:[%s2074_s2] ss:$0 sm:$0xff]  ;;  %s1258_s8 = sshll.u32 %s1698_s15, 5 }
  0x44   : > { %286 = vst.msk [vmem:[#allocation2] sm:$0xff] %vm285_vm0, %v1260_v48  ;;  %287 = vst.msk [vmem:[#allocation2 + $0x8] sm:$0xff] %vm285_vm0, %v1260_v48  ;;  %p265_p7 = scmp.lt.s32.totalorder %s1258_s8, 255 }
  0x45   : > { %1386 = vmatpush3.bf16.msra.mxu0 %v1571_v9  ;;  %1501 = vmatpush3.bf16.msra.mxu1 %v1571_v9  ;;  %288 = vst.msk [vmem:[#allocation2 + $0x10] sm:$0xff] %vm285_vm0, %v1260_v48  ;;  %289 = vst.msk [vmem:[#allocation2 + $0x18] sm:$0xff] %vm285_vm0, %v1260_v48 }
  0x46   : > { %1387 = vmatprep.subr.bf16.mxu0 %v1572_v10  ;;  %1494 = vmatprep.subr.bf16.mxu1 %v1572_v10  ;;  %290 = vst.msk [vmem:[#allocation2 + $0x20] sm:$0xff] %vm285_vm0, %v1260_v48  ;;  %291 = vst.msk [vmem:[#allocation2 + $0x28] sm:$0xff] %vm285_vm0, %v1260_v48  ;;  %s2087_s8 = smov (!%p265_p7, %s1258_s8), 255 }
  0x47   : > { %292 = vst.msk [vmem:[#allocation2 + $0x30] sm:$0xff] %vm285_vm0, %v1260_v48  ;;  %293 = vst.msk [vmem:[#allocation2 + $0x38] sm:$0xff] %vm285_vm0, %v1260_v48  ;;  %s1259_s15 = sshll.u32 %s2087_s8, 2 }
  0x48   : > { %294 = vst.msk [vmem:[#allocation2 + $0x40] sm:$0xff] %vm285_vm0, %v1260_v48  ;;  %295 = vst.msk [vmem:[#allocation2 + $0x48] sm:$0xff] %vm285_vm0, %v1260_v48  ;;  %s1962_s29 = scalar_lea.vmem %s2075_s3, %s1259_s15 }
  0x49   : > { %1388 = vmatpush3.bf16.msra.mxu0 %v1573_v13  ;;  %1502 = vmatpush3.bf16.msra.mxu1 %v1573_v13  ;;  %296 = vst.msk [vmem:[#allocation2 + $0x50] sm:$0xff] %vm285_vm0, %v1260_v48  ;;  %297 = vst.msk [vmem:[#allocation2 + $0x58] sm:$0xff] %vm285_vm0, %v1260_v48 }
  0x4a   : > { %1389 = vmatprep.subr.bf16.mxu0 %v1574_v14  ;;  %1495 = vmatprep.subr.bf16.mxu1 %v1574_v14  ;;  %298 = vst.msk [vmem:[#allocation2 + $0x60] sm:$0xff] %vm285_vm0, %v1260_v48  ;;  %299 = vst.msk [vmem:[#allocation2 + $0x68] sm:$0xff] %vm285_vm0, %v1260_v48 }
  0x4b   : > { %300 = vst.msk [vmem:[#allocation2 + $0x70] sm:$0xff] %vm285_vm0, %v1260_v48  ;;  %301 = vst.msk [vmem:[#allocation2 + $0x78] sm:$0xff] %vm285_vm0, %v1260_v48  ;;  %v318_v51 = vld [vmem:[#allocation2] sm:$0xff]  ;;  %v319_v59 = vld [vmem:[#allocation2 + $0x8] sm:$0xff] }
  0x4c   : > { %302 = vst.msk [vmem:[#allocation2 + $0x80] sm:$0xff] %vm285_vm0, %v1260_v48  ;;  %303 = vst.msk [vmem:[#allocation2 + $0x88] sm:$0xff] %vm285_vm0, %v1260_v48  ;;  %v320_v7 = vld [vmem:[#allocation2 + $0x10] sm:$0xff] }
  0x4d   : > { %1390 = vmatpush3.bf16.msra.mxu0 %v1575_v15  ;;  %1503 = vmatpush3.bf16.msra.mxu1 %v1575_v15  ;;  %304 = vst.msk [vmem:[#allocation2 + $0x90] sm:$0xff] %vm285_vm0, %v1260_v48  ;;  %305 = vst.msk [vmem:[#allocation2 + $0x98] sm:$0xff] %vm285_vm0, %v1260_v48  ;;  %v321_v15 = vld [vmem:[#allocation2 + $0x18] sm:$0xff] }
  0x4e   : > { %1391 = vmatprep.subr.bf16.mxu0 %v1576_v16  ;;  %1496 = vmatprep.subr.bf16.mxu1 %v1576_v16  ;;  %306 = vst.msk [vmem:[#allocation2 + $0xa0] sm:$0xff] %vm285_vm0, %v1260_v48  ;;  %307 = vst.msk [vmem:[#allocation2 + $0xa8] sm:$0xff] %vm285_vm0, %v1260_v48 }
  0x4f   : > { %308 = vst.msk [vmem:[#allocation2 + $0xb0] sm:$0xff] %vm285_vm0, %v1260_v48  ;;  %309 = vst.msk [vmem:[#allocation2 + $0xb8] sm:$0xff] %vm285_vm0, %v1260_v48 }
  0x50   : > { %310 = vst.msk [vmem:[#allocation2 + $0xc0] sm:$0xff] %vm285_vm0, %v1260_v48  ;;  %311 = vst.msk [vmem:[#allocation2 + $0xc8] sm:$0xff] %vm285_vm0, %v1260_v48 }
  0x51   : > { %1392 = vmatpush3.bf16.msra.mxu0 %v1577_v17  ;;  %1504 = vmatpush3.bf16.msra.mxu1 %v1577_v17  ;;  %312 = vst.msk [vmem:[#allocation2 + $0xd0] sm:$0xff] %vm285_vm0, %v1260_v48  ;;  %313 = vst.msk [vmem:[#allocation2 + $0xd8] sm:$0xff] %vm285_vm0, %v1260_v48 }
  0x52   : > { %314 = vst.msk [vmem:[#allocation2 + $0xe0] sm:$0xff] %vm285_vm0, %v1260_v48  ;;  %315 = vst.msk [vmem:[#allocation2 + $0xe8] sm:$0xff] %vm285_vm0, %v1260_v48 }
  0x53   : > { %316 = vst.msk [vmem:[#allocation2 + $0xf0] sm:$0xff] %vm285_vm0, %v1260_v48  ;;  %317 = vst.msk [vmem:[#allocation2 + $0xf8] sm:$0xff] %vm285_vm0, %v1260_v48  ;;  %v334_v53 = vld [vmem:[#allocation2 + $0x80] sm:$0xff]  ;;  %v335_v61 = vld [vmem:[#allocation2 + $0x88] sm:$0xff] }
  0x54   : > { %703 = vmatmul.mubr.bf16.vlgmr.msra.gmra.mrb[0].mxu0 %v1578_v18  ;;  %767 = vmatmul.mubr.bf16.vlgmr.msra.gmra.mrb[0].mxu1 %v1581_v19  ;;  %v336_v9 = vld [vmem:[#allocation2 + $0x90] sm:$0xff]  ;;  %v337_v17 = vld [vmem:[#allocation2 + $0x98] sm:$0xff] }
  0x55   : > { %710 = vmatprep.mubr.bf16.mxu0 %v1584_v20  ;;  %774 = vmatprep.mubr.bf16.mxu1 %v1586_v21 }
  0x5c   : > { %711 = vmatmul.mubr.bf16.gmra.mrb[4].mxu0 %v1588_v22  ;;  %775 = vmatmul.mubr.bf16.gmra.mrb[4].mxu1 %v1589_v23 }
  0x5d   : > { %718 = vmatprep.mubr.bf16.mxu0 %v1590_v24  ;;  %782 = vmatprep.mubr.bf16.mxu1 %v1592_v25 }
  0x64   : > { %719 = vmatmul.mubr.bf16.gmra.mrb[8].mxu0 %v1594_v26  ;;  %783 = vmatmul.mubr.bf16.gmra.mrb[8].mxu1 %v1595_v27 }
  0x65   : > { %726 = vmatprep.mubr.bf16.mxu0 %v1596_v28  ;;  %790 = vmatprep.mubr.bf16.mxu1 %v1598_v29 }
  0x6c   : > { %727 = vmatmul.mubr.bf16.gmra.mrb[12].mxu0 %v1600_v30  ;;  %791 = vmatmul.mubr.bf16.gmra.mrb[12].mxu1 %v1601_v31 }
  0x6d   : > { %734 = vmatprep.mubr.bf16.mxu0 %v1602_v32  ;;  %798 = vmatprep.mubr.bf16.mxu1 %v1604_v33 }
  0x74   : > { %735 = vmatmul.mubr.bf16.gmra.mrb[16].mxu0 %v1606_v34  ;;  %799 = vmatmul.mubr.bf16.gmra.mrb[16].mxu1 %v1607_v35 }
  0x75   : > { %742 = vmatprep.mubr.bf16.mxu0 %v1608_v36  ;;  %806 = vmatprep.mubr.bf16.mxu1 %v1610_v37  ;;  %v322_v37 = vld [vmem:[#allocation2 + $0x20] sm:$0xff] }
  0x7c   : > { %743 = vmatmul.mubr.bf16.gmra.mrb[20].mxu0 %v1612_v38  ;;  %807 = vmatmul.mubr.bf16.gmra.mrb[20].mxu1 %v1613_v39  ;;  %v338_v39 = vld [vmem:[#allocation2 + $0xa0] sm:$0xff] }
  0x7d   : > { %750 = vmatprep.mubr.bf16.mxu0 %v1614_v40  ;;  %814 = vmatprep.mubr.bf16.mxu1 %v1616_v41 }
  0x84   : > { %751 = vmatmul.mubr.bf16.gmra.mrb[24].mxu0 %v1618_v42  ;;  %815 = vmatmul.mubr.bf16.gmra.mrb[24].mxu1 %v1619_v43 }
  0x85   : > { %758 = vmatprep.mubr.bf16.mxu0 %v1620_v44  ;;  %822 = vmatprep.mubr.bf16.mxu1 %v1622_v45 }
  0x8c   : > { %759 = vmatmul.mubr.bf16.gmra.mrb[28].mxu0 %v1624_v46  ;;  %823 = vmatmul.mubr.bf16.gmra.mrb[28].mxu1 %v1625_v47  ;;  %v323_v47 = vld [vmem:[#allocation2 + $0x28] sm:$0xff] }
 0x127   : > { %v1393_v49 = vpop.f32.mrb[0].mxu0  ;;  %v1441_v50 = vpop.f32.mrb[0].mxu1 }
 0x128   : > { %v1394_v52 = vpop.f32.mrb[1].mxu0  ;;  %v1442_v54 = vpop.f32.mrb[1].mxu1 }
 0x129   : > { %v1395_v55 = vadd.f32 %v1394_v52, %v1393_v49  ;;  %v1443_v56 = vadd.f32 %v1442_v54, %v1441_v50  ;;  %v1396_v57 = vpop.f32.mrb[2].mxu0  ;;  %v1444_v58 = vpop.f32.mrb[2].mxu1  ;;  %v339_v49 = vld [vmem:[#allocation2 + $0xa8] sm:$0xff] }
 0x12a   : > { %v1397_v60 = vpop.f32.mrb[3].mxu0  ;;  %v1445_v62 = vpop.f32.mrb[3].mxu1 }
 0x12b   : > { %v831_v63 = vadd.f32 %v1395_v55, %v318_v51  ;;  %v847_v0 = vadd.f32 %v1443_v56, %v334_v53  ;;  %v1398_v1 = vadd.f32 %v1397_v60, %v1396_v57  ;;  %v1446_v2 = vadd.f32 %v1445_v62, %v1444_v58 }
 0x12d   : > { %864 = vst.msk [vmem:[#allocation2] sm:$0xff] %vm285_vm0, %v831_v63  ;;  %880 = vst.msk [vmem:[#allocation2 + $0x80] sm:$0xff] %vm285_vm0, %v847_v0  ;;  %v832_v3 = vadd.f32 %v1398_v1, %v319_v59  ;;  %v848_v4 = vadd.f32 %v1446_v2, %v335_v61 }
 0x12f   : > { %865 = vst.msk [vmem:[#allocation2 + $0x8] sm:$0xff] %vm285_vm0, %v832_v3  ;;  %881 = vst.msk [vmem:[#allocation2 + $0x88] sm:$0xff] %vm285_vm0, %v848_v4  ;;  %v1399_v5 = vpop.f32.mrb[4].mxu0  ;;  %v1447_v6 = vpop.f32.mrb[4].mxu1 }
 0x130   : > { %v1400_v8 = vpop.f32.mrb[5].mxu0  ;;  %v1448_v10 = vpop.f32.mrb[5].mxu1 }
 0x131   : > { %v1401_v11 = vadd.f32 %v1400_v8, %v1399_v5  ;;  %v1449_v12 = vadd.f32 %v1448_v10, %v1447_v6  ;;  %v1402_v13 = vpop.f32.mrb[6].mxu0  ;;  %v1450_v14 = vpop.f32.mrb[6].mxu1  ;;  %v324_v5 = vld [vmem:[#allocation2 + $0x30] sm:$0xff] }
 0x132   : > { %v1403_v16 = vpop.f32.mrb[7].mxu0  ;;  %v1451_v18 = vpop.f32.mrb[7].mxu1 }
 0x133   : > { %v833_v19 = vadd.f32 %v1401_v11, %v320_v7  ;;  %v849_v20 = vadd.f32 %v1449_v12, %v336_v9  ;;  %v1404_v21 = vadd.f32 %v1403_v16, %v1402_v13  ;;  %v1452_v22 = vadd.f32 %v1451_v18, %v1450_v14  ;;  %v340_v7 = vld [vmem:[#allocation2 + $0xb0] sm:$0xff] }
 0x134   : > { %v899_v23 = vld [vmem:[#allocation2] sm:$0xff] }
 0x135   : > { %v915_v24 = vld [vmem:[#allocation2 + $0x80] sm:$0xff]  ;;  %v931_v25 = vmax.f32 %v899_v23, 0.0  ;;  %866 = vst.msk [vmem:[#allocation2 + $0x10] sm:$0xff] %vm285_vm0, %v833_v19  ;;  %882 = vst.msk [vmem:[#allocation2 + $0x90] sm:$0xff] %vm285_vm0, %v849_v20  ;;  %v834_v27 = vadd.f32 %v1404_v21, %v321_v15  ;;  %v850_v28 = vadd.f32 %v1452_v22, %v337_v17  ;;  %v325_v15 = vld [vmem:[#allocation2 + $0x38] sm:$0xff] }
 0x136   : > { %v947_v26 = vmax.f32 %v915_v24, 0.0  ;;  %v900_v29 = vld [vmem:[#allocation2 + $0x8] sm:$0xff]  ;;  %v341_v17 = vld [vmem:[#allocation2 + $0xb8] sm:$0xff] }
 0x137   : > { %v916_v30 = vld [vmem:[#allocation2 + $0x88] sm:$0xff]  ;;  %v1345_v31 = vpack.c.bf16 %v931_v25, %v931_v25  ;;  %v932_v33 = vmax.f32 %v900_v29, 0.0  ;;  %867 = vst.msk [vmem:[#allocation2 + $0x18] sm:$0xff] %vm285_vm0, %v834_v27  ;;  %883 = vst.msk [vmem:[#allocation2 + $0x98] sm:$0xff] %vm285_vm0, %v850_v28  ;;  %v1405_v35 = vpop.f32.mrb[8].mxu0  ;;  %v1453_v36 = vpop.f32.mrb[8].mxu1 }
 0x138   : > { %v1361_v32 = vpack.c.bf16 %v947_v26, %v947_v26  ;;  %v948_v34 = vmax.f32 %v916_v30, 0.0  ;;  %v1406_v38 = vpop.f32.mrb[9].mxu0  ;;  %v1454_v40 = vpop.f32.mrb[9].mxu1 }
 0x139   : > { %1092 = vst.msk [vmem:[%s1962_s29] sm:$0xf] %vm1091_vm1, %v1345_v31  ;;  %v1346_v41 = vpack.c.bf16 %v932_v33, %v932_v33  ;;  %v1407_v43 = vadd.f32 %v1406_v38, %v1405_v35  ;;  %v1455_v44 = vadd.f32 %v1454_v40, %v1453_v36  ;;  %v1408_v45 = vpop.f32.mrb[10].mxu0  ;;  %v1456_v46 = vpop.f32.mrb[10].mxu1 }
 0x13a   : > { %1108 = vst.msk [vmem:[%s1962_s29 + $0x40] sm:$0xf] %vm1091_vm1, %v1361_v32  ;;  %v1362_v42 = vpack.c.bf16 %v948_v34, %v948_v34  ;;  %v1409_v48 = vpop.f32.mrb[11].mxu0  ;;  %v1457_v50 = vpop.f32.mrb[11].mxu1 }
 0x13b   : > { %1093 = vst.msk [vmem:[%s1962_s29 + $0x4] sm:$0xf] %vm1091_vm1, %v1346_v41  ;;  %v835_v51 = vadd.f32 %v1407_v43, %v322_v37  ;;  %v851_v52 = vadd.f32 %v1455_v44, %v338_v39  ;;  %v1410_v53 = vadd.f32 %v1409_v48, %v1408_v45  ;;  %v1458_v54 = vadd.f32 %v1457_v50, %v1456_v46  ;;  %v326_v37 = vld [vmem:[#allocation2 + $0x40] sm:$0xff] }
 0x13c   : > { %1109 = vst.msk [vmem:[%s1962_s29 + $0x44] sm:$0xf] %vm1091_vm1, %v1362_v42  ;;  %v901_v55 = vld [vmem:[#allocation2 + $0x10] sm:$0xff]  ;;  %v342_v39 = vld [vmem:[#allocation2 + $0xc0] sm:$0xff] }
 0x13d   : > { %v917_v56 = vld [vmem:[#allocation2 + $0x90] sm:$0xff]  ;;  %v933_v57 = vmax.f32 %v901_v55, 0.0  ;;  %868 = vst.msk [vmem:[#allocation2 + $0x20] sm:$0xff] %vm285_vm0, %v835_v51  ;;  %884 = vst.msk [vmem:[#allocation2 + $0xa0] sm:$0xff] %vm285_vm0, %v851_v52  ;;  %v836_v59 = vadd.f32 %v1410_v53, %v323_v47  ;;  %v852_v60 = vadd.f32 %v1458_v54, %v339_v49  ;;  %v327_v47 = vld [vmem:[#allocation2 + $0x48] sm:$0xff] }
 0x13e   : > { %v949_v58 = vmax.f32 %v917_v56, 0.0  ;;  %v902_v61 = vld [vmem:[#allocation2 + $0x18] sm:$0xff]  ;;  %v343_v49 = vld [vmem:[#allocation2 + $0xc8] sm:$0xff] }
 0x13f   : > { %v918_v62 = vld [vmem:[#allocation2 + $0x98] sm:$0xff]  ;;  %v1347_v63 = vpack.c.bf16 %v933_v57, %v933_v57  ;;  %v934_v1 = vmax.f32 %v902_v61, 0.0  ;;  %869 = vst.msk [vmem:[#allocation2 + $0x28] sm:$0xff] %vm285_vm0, %v836_v59  ;;  %885 = vst.msk [vmem:[#allocation2 + $0xa8] sm:$0xff] %vm285_vm0, %v852_v60  ;;  %v1411_v3 = vpop.f32.mrb[12].mxu0  ;;  %v1459_v4 = vpop.f32.mrb[12].mxu1 }
 0x140   : > { %v1363_v0 = vpack.c.bf16 %v949_v58, %v949_v58  ;;  %v950_v2 = vmax.f32 %v918_v62, 0.0  ;;  %v1412_v6 = vpop.f32.mrb[13].mxu0  ;;  %v1460_v8 = vpop.f32.mrb[13].mxu1 }
 0x141   : > { %1094 = vst.msk [vmem:[%s1962_s29 + $0x8] sm:$0xf] %vm1091_vm1, %v1347_v63  ;;  %v1348_v9 = vpack.c.bf16 %v934_v1, %v934_v1  ;;  %v1413_v11 = vadd.f32 %v1412_v6, %v1411_v3  ;;  %v1461_v12 = vadd.f32 %v1460_v8, %v1459_v4  ;;  %v1414_v13 = vpop.f32.mrb[14].mxu0  ;;  %v1462_v14 = vpop.f32.mrb[14].mxu1 }
 0x142   : > { %1110 = vst.msk [vmem:[%s1962_s29 + $0x48] sm:$0xf] %vm1091_vm1, %v1363_v0  ;;  %v1364_v10 = vpack.c.bf16 %v950_v2, %v950_v2  ;;  %v1415_v16 = vpop.f32.mrb[15].mxu0  ;;  %v1463_v18 = vpop.f32.mrb[15].mxu1 }
 0x143   : > { %1095 = vst.msk [vmem:[%s1962_s29 + $0xc] sm:$0xf] %vm1091_vm1, %v1348_v9  ;;  %v837_v19 = vadd.f32 %v1413_v11, %v324_v5  ;;  %v853_v20 = vadd.f32 %v1461_v12, %v340_v7  ;;  %v1416_v21 = vadd.f32 %v1415_v16, %v1414_v13  ;;  %v1464_v22 = vadd.f32 %v1463_v18, %v1462_v14  ;;  %v328_v5 = vld [vmem:[#allocation2 + $0x50] sm:$0xff] }
 0x144   : > { %1111 = vst.msk [vmem:[%s1962_s29 + $0x4c] sm:$0xf] %vm1091_vm1, %v1364_v10  ;;  %v903_v23 = vld [vmem:[#allocation2 + $0x20] sm:$0xff]  ;;  %v344_v7 = vld [vmem:[#allocation2 + $0xd0] sm:$0xff] }
 0x145   : > { %v919_v24 = vld [vmem:[#allocation2 + $0xa0] sm:$0xff]  ;;  %v935_v25 = vmax.f32 %v903_v23, 0.0  ;;  %870 = vst.msk [vmem:[#allocation2 + $0x30] sm:$0xff] %vm285_vm0, %v837_v19  ;;  %886 = vst.msk [vmem:[#allocation2 + $0xb0] sm:$0xff] %vm285_vm0, %v853_v20  ;;  %v838_v27 = vadd.f32 %v1416_v21, %v325_v15  ;;  %v854_v28 = vadd.f32 %v1464_v22, %v341_v17  ;;  %v329_v15 = vld [vmem:[#allocation2 + $0x58] sm:$0xff] }
 0x146   : > { %v951_v26 = vmax.f32 %v919_v24, 0.0  ;;  %v904_v29 = vld [vmem:[#allocation2 + $0x28] sm:$0xff]  ;;  %v345_v17 = vld [vmem:[#allocation2 + $0xd8] sm:$0xff] }
 0x147   : > { %v920_v30 = vld [vmem:[#allocation2 + $0xa8] sm:$0xff]  ;;  %v1349_v31 = vpack.c.bf16 %v935_v25, %v935_v25  ;;  %v936_v33 = vmax.f32 %v904_v29, 0.0  ;;  %871 = vst.msk [vmem:[#allocation2 + $0x38] sm:$0xff] %vm285_vm0, %v838_v27  ;;  %887 = vst.msk [vmem:[#allocation2 + $0xb8] sm:$0xff] %vm285_vm0, %v854_v28  ;;  %v1417_v35 = vpop.f32.mrb[16].mxu0  ;;  %v1465_v36 = vpop.f32.mrb[16].mxu1 }
 0x148   : > { %v1365_v32 = vpack.c.bf16 %v951_v26, %v951_v26  ;;  %v952_v34 = vmax.f32 %v920_v30, 0.0  ;;  %v1418_v38 = vpop.f32.mrb[17].mxu0  ;;  %v1466_v40 = vpop.f32.mrb[17].mxu1 }
 0x149   : > { %1096 = vst.msk [vmem:[%s1962_s29 + $0x10] sm:$0xf] %vm1091_vm1, %v1349_v31  ;;  %v1350_v41 = vpack.c.bf16 %v936_v33, %v936_v33  ;;  %v1419_v43 = vadd.f32 %v1418_v38, %v1417_v35  ;;  %v1467_v44 = vadd.f32 %v1466_v40, %v1465_v36  ;;  %v1420_v45 = vpop.f32.mrb[18].mxu0  ;;  %v1468_v46 = vpop.f32.mrb[18].mxu1 }
 0x14a   : > { %1112 = vst.msk [vmem:[%s1962_s29 + $0x50] sm:$0xf] %vm1091_vm1, %v1365_v32  ;;  %v1366_v42 = vpack.c.bf16 %v952_v34, %v952_v34  ;;  %v1421_v48 = vpop.f32.mrb[19].mxu0  ;;  %v1469_v50 = vpop.f32.mrb[19].mxu1 }
 0x14b   : > { %1097 = vst.msk [vmem:[%s1962_s29 + $0x14] sm:$0xf] %vm1091_vm1, %v1350_v41  ;;  %v839_v51 = vadd.f32 %v1419_v43, %v326_v37  ;;  %v855_v52 = vadd.f32 %v1467_v44, %v342_v39  ;;  %v1422_v53 = vadd.f32 %v1421_v48, %v1420_v45  ;;  %v1470_v54 = vadd.f32 %v1469_v50, %v1468_v46  ;;  %v330_v37 = vld [vmem:[#allocation2 + $0x60] sm:$0xff] }
 0x14c   : > { %1113 = vst.msk [vmem:[%s1962_s29 + $0x54] sm:$0xf] %vm1091_vm1, %v1366_v42  ;;  %v905_v55 = vld [vmem:[#allocation2 + $0x30] sm:$0xff]  ;;  %v346_v39 = vld [vmem:[#allocation2 + $0xe0] sm:$0xff] }
 0x14d   : > { %v921_v56 = vld [vmem:[#allocation2 + $0xb0] sm:$0xff]  ;;  %v937_v57 = vmax.f32 %v905_v55, 0.0  ;;  %872 = vst.msk [vmem:[#allocation2 + $0x40] sm:$0xff] %vm285_vm0, %v839_v51  ;;  %888 = vst.msk [vmem:[#allocation2 + $0xc0] sm:$0xff] %vm285_vm0, %v855_v52  ;;  %v840_v59 = vadd.f32 %v1422_v53, %v327_v47  ;;  %v856_v60 = vadd.f32 %v1470_v54, %v343_v49  ;;  %v331_v47 = vld [vmem:[#allocation2 + $0x68] sm:$0xff] }
 0x14e   : > { %v953_v58 = vmax.f32 %v921_v56, 0.0  ;;  %v906_v61 = vld [vmem:[#allocation2 + $0x38] sm:$0xff]  ;;  %v347_v49 = vld [vmem:[#allocation2 + $0xe8] sm:$0xff] }
 0x14f   : > { %v922_v62 = vld [vmem:[#allocation2 + $0xb8] sm:$0xff]  ;;  %v1351_v63 = vpack.c.bf16 %v937_v57, %v937_v57  ;;  %v938_v1 = vmax.f32 %v906_v61, 0.0  ;;  %873 = vst.msk [vmem:[#allocation2 + $0x48] sm:$0xff] %vm285_vm0, %v840_v59  ;;  %889 = vst.msk [vmem:[#allocation2 + $0xc8] sm:$0xff] %vm285_vm0, %v856_v60  ;;  %v1423_v3 = vpop.f32.mrb[20].mxu0  ;;  %v1471_v4 = vpop.f32.mrb[20].mxu1 }
 0x150   : > { %v1367_v0 = vpack.c.bf16 %v953_v58, %v953_v58  ;;  %v954_v2 = vmax.f32 %v922_v62, 0.0  ;;  %v1424_v6 = vpop.f32.mrb[21].mxu0  ;;  %v1472_v8 = vpop.f32.mrb[21].mxu1 }
 0x151   : > { %1098 = vst.msk [vmem:[%s1962_s29 + $0x18] sm:$0xf] %vm1091_vm1, %v1351_v63  ;;  %v1352_v9 = vpack.c.bf16 %v938_v1, %v938_v1  ;;  %v1425_v11 = vadd.f32 %v1424_v6, %v1423_v3  ;;  %v1473_v12 = vadd.f32 %v1472_v8, %v1471_v4  ;;  %v1426_v13 = vpop.f32.mrb[22].mxu0  ;;  %v1474_v14 = vpop.f32.mrb[22].mxu1 }
 0x152   : > { %1114 = vst.msk [vmem:[%s1962_s29 + $0x58] sm:$0xf] %vm1091_vm1, %v1367_v0  ;;  %v1368_v10 = vpack.c.bf16 %v954_v2, %v954_v2  ;;  %v1427_v16 = vpop.f32.mrb[23].mxu0  ;;  %v1475_v18 = vpop.f32.mrb[23].mxu1 }
 0x153   : > { %1099 = vst.msk [vmem:[%s1962_s29 + $0x1c] sm:$0xf] %vm1091_vm1, %v1352_v9  ;;  %v841_v19 = vadd.f32 %v1425_v11, %v328_v5  ;;  %v857_v20 = vadd.f32 %v1473_v12, %v344_v7  ;;  %v1428_v21 = vadd.f32 %v1427_v16, %v1426_v13  ;;  %v1476_v22 = vadd.f32 %v1475_v18, %v1474_v14  ;;  %v332_v5 = vld [vmem:[#allocation2 + $0x70] sm:$0xff] }
 0x154   : > { %1115 = vst.msk [vmem:[%s1962_s29 + $0x5c] sm:$0xf] %vm1091_vm1, %v1368_v10  ;;  %v907_v23 = vld [vmem:[#allocation2 + $0x40] sm:$0xff]  ;;  %v348_v7 = vld [vmem:[#allocation2 + $0xf0] sm:$0xff] }
 0x155   : > { %v923_v24 = vld [vmem:[#allocation2 + $0xc0] sm:$0xff]  ;;  %v939_v25 = vmax.f32 %v907_v23, 0.0  ;;  %874 = vst.msk [vmem:[#allocation2 + $0x50] sm:$0xff] %vm285_vm0, %v841_v19  ;;  %890 = vst.msk [vmem:[#allocation2 + $0xd0] sm:$0xff] %vm285_vm0, %v857_v20  ;;  %v842_v27 = vadd.f32 %v1428_v21, %v329_v15  ;;  %v858_v28 = vadd.f32 %v1476_v22, %v345_v17  ;;  %v333_v15 = vld [vmem:[#allocation2 + $0x78] sm:$0xff] }
 0x156   : > { %v955_v26 = vmax.f32 %v923_v24, 0.0  ;;  %v908_v29 = vld [vmem:[#allocation2 + $0x48] sm:$0xff]  ;;  %v349_v17 = vld [vmem:[#allocation2 + $0xf8] sm:$0xff] }
 0x157   : > { %v924_v30 = vld [vmem:[#allocation2 + $0xc8] sm:$0xff]  ;;  %v1353_v31 = vpack.c.bf16 %v939_v25, %v939_v25  ;;  %v940_v33 = vmax.f32 %v908_v29, 0.0  ;;  %875 = vst.msk [vmem:[#allocation2 + $0x58] sm:$0xff] %vm285_vm0, %v842_v27  ;;  %891 = vst.msk [vmem:[#allocation2 + $0xd8] sm:$0xff] %vm285_vm0, %v858_v28  ;;  %v1429_v35 = vpop.f32.mrb[24].mxu0  ;;  %v1477_v36 = vpop.f32.mrb[24].mxu1 }
 0x158   : > { %v1369_v32 = vpack.c.bf16 %v955_v26, %v955_v26  ;;  %v956_v34 = vmax.f32 %v924_v30, 0.0  ;;  %v1430_v38 = vpop.f32.mrb[25].mxu0  ;;  %v1478_v40 = vpop.f32.mrb[25].mxu1 }
 0x159   : > { %1100 = vst.msk [vmem:[%s1962_s29 + $0x20] sm:$0xf] %vm1091_vm1, %v1353_v31  ;;  %v1354_v41 = vpack.c.bf16 %v940_v33, %v940_v33  ;;  %v1431_v43 = vadd.f32 %v1430_v38, %v1429_v35  ;;  %v1479_v44 = vadd.f32 %v1478_v40, %v1477_v36  ;;  %v1432_v45 = vpop.f32.mrb[26].mxu0  ;;  %v1480_v46 = vpop.f32.mrb[26].mxu1 }
 0x15a   : > { %1116 = vst.msk [vmem:[%s1962_s29 + $0x60] sm:$0xf] %vm1091_vm1, %v1369_v32  ;;  %v1370_v42 = vpack.c.bf16 %v956_v34, %v956_v34  ;;  %v1433_v48 = vpop.f32.mrb[27].mxu0  ;;  %v1481_v50 = vpop.f32.mrb[27].mxu1 }
 0x15b   : > { %1101 = vst.msk [vmem:[%s1962_s29 + $0x24] sm:$0xf] %vm1091_vm1, %v1354_v41  ;;  %v843_v51 = vadd.f32 %v1431_v43, %v330_v37  ;;  %v859_v52 = vadd.f32 %v1479_v44, %v346_v39  ;;  %v1434_v53 = vadd.f32 %v1433_v48, %v1432_v45  ;;  %v1482_v54 = vadd.f32 %v1481_v50, %v1480_v46 }
 0x15c   : > { %1117 = vst.msk [vmem:[%s1962_s29 + $0x64] sm:$0xf] %vm1091_vm1, %v1370_v42  ;;  %v909_v55 = vld [vmem:[#allocation2 + $0x50] sm:$0xff] }
 0x15d   : > { %v925_v56 = vld [vmem:[#allocation2 + $0xd0] sm:$0xff]  ;;  %v941_v57 = vmax.f32 %v909_v55, 0.0  ;;  %876 = vst.msk [vmem:[#allocation2 + $0x60] sm:$0xff] %vm285_vm0, %v843_v51  ;;  %892 = vst.msk [vmem:[#allocation2 + $0xe0] sm:$0xff] %vm285_vm0, %v859_v52  ;;  %v844_v59 = vadd.f32 %v1434_v53, %v331_v47  ;;  %v860_v60 = vadd.f32 %v1482_v54, %v347_v49 }
 0x15e   : > { %v957_v58 = vmax.f32 %v925_v56, 0.0  ;;  %v910_v61 = vld [vmem:[#allocation2 + $0x58] sm:$0xff] }
 0x15f   : > { %v926_v62 = vld [vmem:[#allocation2 + $0xd8] sm:$0xff]  ;;  %v1355_v63 = vpack.c.bf16 %v941_v57, %v941_v57  ;;  %v942_v1 = vmax.f32 %v910_v61, 0.0  ;;  %877 = vst.msk [vmem:[#allocation2 + $0x68] sm:$0xff] %vm285_vm0, %v844_v59  ;;  %893 = vst.msk [vmem:[#allocation2 + $0xe8] sm:$0xff] %vm285_vm0, %v860_v60  ;;  %v1435_v3 = vpop.f32.mrb[28].mxu0  ;;  %v1483_v4 = vpop.f32.mrb[28].mxu1 }
 0x160   : > { %v1371_v0 = vpack.c.bf16 %v957_v58, %v957_v58  ;;  %v958_v2 = vmax.f32 %v926_v62, 0.0  ;;  %v1436_v6 = vpop.f32.mrb[29].mxu0  ;;  %v1484_v8 = vpop.f32.mrb[29].mxu1 }
 0x161   : > { %1102 = vst.msk [vmem:[%s1962_s29 + $0x28] sm:$0xf] %vm1091_vm1, %v1355_v63  ;;  %v1356_v9 = vpack.c.bf16 %v942_v1, %v942_v1  ;;  %v1437_v11 = vadd.f32 %v1436_v6, %v1435_v3  ;;  %v1485_v12 = vadd.f32 %v1484_v8, %v1483_v4  ;;  %v1438_v13 = vpop.f32.mrb[30].mxu0  ;;  %v1486_v14 = vpop.f32.mrb[30].mxu1 }
 0x162   : > { %1118 = vst.msk [vmem:[%s1962_s29 + $0x68] sm:$0xf] %vm1091_vm1, %v1371_v0  ;;  %v1372_v10 = vpack.c.bf16 %v958_v2, %v958_v2  ;;  %v1439_v16 = vpop.f32.mrb[31].mxu0  ;;  %v1487_v18 = vpop.f32.mrb[31].mxu1 }
 0x163   : > { %1103 = vst.msk [vmem:[%s1962_s29 + $0x2c] sm:$0xf] %vm1091_vm1, %v1356_v9  ;;  %v845_v19 = vadd.f32 %v1437_v11, %v332_v5  ;;  %v861_v20 = vadd.f32 %v1485_v12, %v348_v7  ;;  %v1440_v21 = vadd.f32 %v1439_v16, %v1438_v13  ;;  %v1488_v22 = vadd.f32 %v1487_v18, %v1486_v14 }
 0x164   : > { %1119 = vst.msk [vmem:[%s1962_s29 + $0x6c] sm:$0xf] %vm1091_vm1, %v1372_v10  ;;  %v911_v23 = vld [vmem:[#allocation2 + $0x60] sm:$0xff] }
 0x165   : > { %v927_v24 = vld [vmem:[#allocation2 + $0xe0] sm:$0xff]  ;;  %v943_v25 = vmax.f32 %v911_v23, 0.0  ;;  %878 = vst.msk [vmem:[#allocation2 + $0x70] sm:$0xff] %vm285_vm0, %v845_v19  ;;  %894 = vst.msk [vmem:[#allocation2 + $0xf0] sm:$0xff] %vm285_vm0, %v861_v20  ;;  %v846_v27 = vadd.f32 %v1440_v21, %v333_v15  ;;  %v862_v28 = vadd.f32 %v1488_v22, %v349_v17 }
 0x166   : > { %v959_v26 = vmax.f32 %v927_v24, 0.0  ;;  %v912_v29 = vld [vmem:[#allocation2 + $0x68] sm:$0xff] }
 0x167   : > { %v928_v30 = vld [vmem:[#allocation2 + $0xe8] sm:$0xff]  ;;  %v1357_v31 = vpack.c.bf16 %v943_v25, %v943_v25  ;;  %v944_v33 = vmax.f32 %v912_v29, 0.0  ;;  %879 = vst.msk [vmem:[#allocation2 + $0x78] sm:$0xff] %vm285_vm0, %v846_v27  ;;  %895 = vst.msk [vmem:[#allocation2 + $0xf8] sm:$0xff] %vm285_vm0, %v862_v28 }
 0x168   : > { %v1373_v32 = vpack.c.bf16 %v959_v26, %v959_v26  ;;  %v960_v34 = vmax.f32 %v928_v30, 0.0 }
 0x169   : > { %1104 = vst.msk [vmem:[%s1962_s29 + $0x30] sm:$0xf] %vm1091_vm1, %v1357_v31  ;;  %v1358_v35 = vpack.c.bf16 %v944_v33, %v944_v33 }
 0x16a   : > { %1120 = vst.msk [vmem:[%s1962_s29 + $0x70] sm:$0xf] %vm1091_vm1, %v1373_v32  ;;  %v1374_v36 = vpack.c.bf16 %v960_v34, %v960_v34 }
 0x16b   : > { %1105 = vst.msk [vmem:[%s1962_s29 + $0x34] sm:$0xf] %vm1091_vm1, %v1358_v35 }
 0x16c   : > { %1121 = vst.msk [vmem:[%s1962_s29 + $0x74] sm:$0xf] %vm1091_vm1, %v1374_v36  ;;  %v913_v37 = vld [vmem:[#allocation2 + $0x70] sm:$0xff] }
 0x16d   : > { %v929_v38 = vld [vmem:[#allocation2 + $0xf0] sm:$0xff]  ;;  %v945_v39 = vmax.f32 %v913_v37, 0.0 }
 0x16e   : > { %v961_v40 = vmax.f32 %v929_v38, 0.0  ;;  %v914_v41 = vld [vmem:[#allocation2 + $0x78] sm:$0xff] }
 0x16f   : > { %v930_v42 = vld [vmem:[#allocation2 + $0xf8] sm:$0xff]  ;;  %v1359_v43 = vpack.c.bf16 %v945_v39, %v945_v39  ;;  %v946_v45 = vmax.f32 %v914_v41, 0.0 }
 0x170   : > { %v1375_v44 = vpack.c.bf16 %v961_v40, %v961_v40  ;;  %v962_v46 = vmax.f32 %v930_v42, 0.0 }
 0x171   : > { %1106 = vst.msk [vmem:[%s1962_s29 + $0x38] sm:$0xf] %vm1091_vm1, %v1359_v43  ;;  %v1360_v47 = vpack.c.bf16 %v946_v45, %v946_v45 }
 0x172   : > { %1122 = vst.msk [vmem:[%s1962_s29 + $0x78] sm:$0xf] %vm1091_vm1, %v1375_v44  ;;  %v1376_v48 = vpack.c.bf16 %v962_v46, %v962_v46 }
 0x173   : > { %1107 = vst.msk [vmem:[%s1962_s29 + $0x3c] sm:$0xf] %vm1091_vm1, %v1360_v47 }
 0x174   : > { %1123 = vst.msk [vmem:[%s1962_s29 + $0x7c] sm:$0xf] %vm1091_vm1, %v1376_v48 }
 0x175 PF: > { %s16_s17 = sadd.s32 1, %s1706_s17   ;;  %s2079_s12 = smov %s1690_s13 }
 0x176   : > { %p13_p9 = scmp.ge.s32.totalorder %s16_s17, 10   ;;  %s2080_s13 = smov %s1694_s14 }
 0x177   : > { %s2081_s14 = smov %s1780_s24  ;;  %s2082_s15 = smov %s1702_s16 }
 0x178   : > { %s2083_s16 = smov %s2085_s19  ;;  %15 = sbr.rel (!%p13_p9) target bundleno = 4 (0x4), region = 86 }
 0x17f   :  { %1152 = vsyncpa [#allocation4], 1 }
 0x180   :  { %1154 = vsyncpa [#allocation4 + $0x1], 1 }

</bundles_post_ra>
